<compile_context>
chip_gen: v7x
topology: tpu7x:2x2x1
jax: 0.10.0
libtpu: 0.0.40
codegen_flags: <defaults>
</compile_context>

<pallas_src>
import functools

import jax
import jax.numpy as jnp
from jax import lax
from jax.experimental import pallas as pl
from jax.experimental.pallas import tpu as pltpu

_NEG = -1e30        # padded last-layer logit columns -> exp() underflows to exactly 0
_LANE = 128         # lane width; do NOT widen (real feature dims are tiny)
_ROW_CHUNK = 128    # rows per inner sub-slice -> bounded vreg pressure


def _round_up(n, m):
    return ((n + m - 1) // m) * m


def _cdiv(a, b):
    return (a + b - 1) // b


# -----------------------------------------------------------------------------
# Kernel: full MLP stack + softmax on one (bm, Dp) activation tile.
# -----------------------------------------------------------------------------
def _mlp_softmax_kernel(x_ref, w_ref, b_ref, o_ref, *, row_chunk):
    # x_ref: (bm, Dp)   w_ref: (L, Dp, Dp)   b_ref: (L, 1, Dp)   o_ref: (bm, Dp)
    n_layers = w_ref.shape[0]
    bm = x_ref.shape[0]
    n_full = bm // row_chunk
    tail = bm - n_full * row_chunk

    def run_rows(h):
        # Linear stack (x @ W + b, ReLU between layers), then lane-wise softmax.
        for i in range(n_layers):                                  # static unroll
            h = jnp.dot(h, w_ref[i], preferred_element_type=jnp.float32) + b_ref[i]
            if i < n_layers - 1:
                h = jnp.maximum(h, 0.0)
        m = jnp.max(h, axis=-1, keepdims=True)
        e = jnp.exp(h - m)
        s = jnp.sum(e, axis=-1, keepdims=True)
        # approx=False: approximate vrcp would break the 1e-5 check vs softmax.
        return e * pl.reciprocal(s, approx=False)

    if n_full > 0:
        def body(c, carry):
            r0 = pl.multiple_of(c * row_chunk, row_chunk)
            rows = x_ref[pl.ds(r0, row_chunk), :]
            o_ref[pl.ds(r0, row_chunk), :] = run_rows(rows).astype(o_ref.dtype)
            return carry

        lax.fori_loop(0, n_full, body, 0, unroll=True)

    if tail > 0:                                  # static trailing sub-slice (8-aligned)
        r0 = n_full * row_chunk
        o_ref[pl.ds(r0, tail), :] = run_rows(x_ref[pl.ds(r0, tail), :]).astype(o_ref.dtype)


# -----------------------------------------------------------------------------
# One-time parameter packing (hoisted out of the per-call forward path).
# -----------------------------------------------------------------------------
def pack_params(params, *, lane=_LANE):
    """Pack per-layer (W: (in, out), b: (out,)) into tile-aligned f32 slabs.

    Call ONCE at init and reuse; the pads/stacks are plain XLA ops that would
    otherwise dominate the microsecond-scale kernel on every forward call.
    """
    n_layers = len(params)
    in_dim = params[0][0].shape[0]
    out_dim = params[-1][0].shape[1]
    dims = [in_dim] + [w.shape[1] for w, _ in params]
    dp = _round_up(max(dims), lane)

    w_blocks, b_blocks = [], []
    for i, (w, b) in enumerate(params):
        w = jnp.asarray(w, jnp.float32)
        b = jnp.asarray(b, jnp.float32)
        wp = jnp.pad(w, ((0, dp - w.shape[0]), (0, dp - w.shape[1])))
        fill = _NEG if i == n_layers - 1 else 0.0   # mask padded logits via last bias
        bp = jnp.pad(b, (0, dp - b.shape[0]), constant_values=fill)
        w_blocks.append(wp)
        b_blocks.append(bp.reshape(1, dp))
    w_packed = jnp.stack(w_blocks)                  # (L, Dp, Dp)
    b_packed = jnp.stack(b_blocks)                  # (L, 1, Dp)
    return w_packed, b_packed, in_dim, out_dim


def _pick_tiling(batch, block_batch):
    """Pick (bm, b_pad): small row padding; even >=2-step grid when batch is big."""
    b_min = _round_up(batch, 8)
    n_tiles = _cdiv(b_min, block_batch)
    if b_min >= 2 * _ROW_CHUNK:                     # enough work for both v7x TCs
        n_tiles = max(n_tiles, 2)
        n_tiles += n_tiles % 2                      # even grid-step count
    bm = _round_up(_cdiv(b_min, n_tiles), 8)
    return bm, n_tiles * bm


# -----------------------------------------------------------------------------
# Forward pass.
# -----------------------------------------------------------------------------
def machine_policy_forward(x, packed, *, block_batch=512):
    w_packed, b_packed, in_dim, out_dim = packed
    n_layers, dp = w_packed.shape[0], w_packed.shape[-1]
    batch = x.shape[0]

    bm, b_pad = _pick_tiling(batch, block_batch)
    grid = (b_pad // bm,)

    x_p = jnp.pad(x.astype(jnp.float32), ((0, b_pad - batch), (0, dp - in_dim)))

    # Explicit VMEM budget: single-buffered resident slabs + double-buffered
    # streaming tiles + headroom (v7x: 64 MiB phys / 32 MiB scoped default;
    # v5e scoped default is only 16 MiB).
    resident = 4 * (n_layers * dp * dp + n_layers * dp)
    streaming = 4 * (2 * bm * dp) * 2
    vmem_limit = max(int(1.25 * (resident + streaming)) + (2 << 20), 32 << 20)

    def _resident_spec(shape):
        idx = lambda i: (0,) * len(shape)
        try:    # single-buffer the VMEM-resident slabs (constant index_map)
            return pl.BlockSpec(shape, idx, pipeline_mode=pl.Buffered(1))
        except TypeError:
            return pl.BlockSpec(shape, idx)

    cost = pl.CostEstimate(
        flops=2 * b_pad * dp * dp * n_layers,
        transcendentals=b_pad * dp,
        bytes_accessed=4 * (2 * b_pad * dp + n_layers * dp * dp + n_layers * dp),
    )

    out_p = pl.pallas_call(
        functools.partial(_mlp_softmax_kernel, row_chunk=_ROW_CHUNK),
        out_shape=jax.ShapeDtypeStruct((b_pad, dp), jnp.float32),
        grid=grid,
        in_specs=[
            pl.BlockSpec((bm, dp), lambda i: (i, 0)),     # activations stream
            _resident_spec((n_layers, dp, dp)),           # weights VMEM-resident
            _resident_spec((n_layers, 1, dp)),            # biases VMEM-resident
        ],
        out_specs=pl.BlockSpec((bm, dp), lambda i: (i, 0)),
        compiler_params=pltpu.CompilerParams(
            dimension_semantics=("parallel",),
            vmem_limit_bytes=vmem_limit,
        ),
        cost_estimate=cost,
    )(x_p, w_packed, b_packed)

    return out_p[:batch, :out_dim].astype(x.dtype)


# -----------------------------------------------------------------------------
# Init + pure-JAX reference + self-test.
# -----------------------------------------------------------------------------
def init_params(key, input_size_2, hidden_size, hidden_layer_2, output_size_2):
    """torch.nn.Linear-style init (U(-k, k), k=1/sqrt(fan_in)); W stored (in, out)."""
    dims = [input_size_2] + [hidden_size] * hidden_layer_2 + [output_size_2]
    params = []
    for din, dout in zip(dims[:-1], dims[1:]):
        key, kw, kb = jax.random.split(key, 3)
        bound = 1.0 / jnp.sqrt(jnp.float32(din))
        w = jax.random.uniform(kw, (din, dout), jnp.float32, -bound, bound)
        b = jax.random.uniform(kb, (dout,), jnp.float32, -bound, bound)
        params.append((w, b))
    return params


def _reference_forward(x, params):
    h = x
    for i, (w, b) in enumerate(params):
        h = h @ w + b
        if i < len(params) - 1:
            h = jnp.maximum(h, 0.0)
    return jax.nn.softmax(h, axis=-1)


if __name__ == "__main__":
    # Small hyper-parameters consistent with the nn.Module __init__.
    input_size_2 = 16
    hidden_size = 32
    hidden_layer_2 = 2   # -> 2 hidden Linear+ReLU pairs, then output Linear
    output_size_2 = 8
    batch = 4

    key = jax.random.PRNGKey(0)
    key, kx = jax.random.split(key)
    x = jax.random.normal(kx, (batch, input_size_2), jnp.float32)

    params = init_params(key, input_size_2, hidden_size, hidden_layer_2, output_size_2)

    packed = pack_params(params)            # pack ONCE, reuse across forward calls
    packed = jax.tree_util.tree_map(jax.block_until_ready, packed)

    out = machine_policy_forward(x, packed)
    out = jax.block_until_ready(out)

    ref = _reference_forward(x, params)
    assert out.shape == (batch, output_size_2)
    assert jnp.allclose(out, ref, atol=1e-5, rtol=1e-5)
    assert jnp.allclose(jnp.sum(out, axis=-1), 1.0, atol=1e-5)

    print("KERNEL_OK")
</pallas_src>

<mosaic_0001>
module attributes {stable_mosaic.version = 11 : i64} {
  func.func @_mlp_softmax_kernel(%arg0: i32, %arg1: memref<8x128xf32, #tpu.memory_space<vmem>>, %arg2: memref<3x128x128xf32, #tpu.memory_space<vmem>>, %arg3: memref<3x1x128xf32, #tpu.memory_space<vmem>>, %arg4: memref<8x128xf32, #tpu.memory_space<vmem>>) attributes {dimension_semantics = [#tpu.dimension_semantics<parallel>], iteration_bounds = array<i64: 1>, scalar_prefetch = 0 : i64, scratch_operands = 0 : i64, tpu.core_type = #tpu.core_type<tc>, window_params = [{transform_indices = @transform_0, window_bounds = array<i64: 8, 128>}, {pipeline_mode = #tpu.pipeline_mode<synchronous>, transform_indices = @transform_1, window_bounds = array<i64: 3, 128, 128>}, {pipeline_mode = #tpu.pipeline_mode<synchronous>, transform_indices = @transform_2, window_bounds = array<i64: 3, 1, 128>}, {transform_indices = @transform_3, window_bounds = array<i64: 8, 128>}]} {
    %c0 = arith.constant 0 : index
    %c0_0 = arith.constant 0 : index
    %0 = vector.load %arg1[%c0, %c0_0] : memref<8x128xf32, #tpu.memory_space<vmem>>, vector<8x128xf32>
    %c0_1 = arith.constant 0 : index
    %c0_2 = arith.constant 0 : index
    %c0_3 = arith.constant 0 : index
    %1 = vector.load %arg2[%c0_1, %c0_2, %c0_3] : memref<3x128x128xf32, #tpu.memory_space<vmem>>, vector<1x128x128xf32>
    %2 = vector.shape_cast %1 : vector<1x128x128xf32> to vector<128x128xf32>
    %cst = arith.constant dense<0.000000e+00> : vector<8x128xf32>
    %3 = tpu.matmul %0, %2, %cst {dimension_numbers = #tpu.dot_dimension_numbers<[1], [0], [0], [1], [0, 0, 1, 1], [], []>} : vector<8x128xf32>, vector<128x128xf32>, vector<8x128xf32> -> vector<8x128xf32>
    %c0_4 = arith.constant 0 : index
    %c0_5 = arith.constant 0 : index
    %c0_6 = arith.constant 0 : index
    %4 = vector.load %arg3[%c0_4, %c0_5, %c0_6] : memref<3x1x128xf32, #tpu.memory_space<vmem>>, vector<1x1x128xf32>
    %5 = vector.shape_cast %4 : vector<1x1x128xf32> to vector<1x128xf32>
    %6 = vector.broadcast %5 : vector<1x128xf32> to vector<8x128xf32>
    %7 = arith.addf %3, %6 : vector<8x128xf32>
    %cst_7 = arith.constant 0.000000e+00 : f32
    %8 = vector.broadcast %cst_7 : f32 to vector<8x128xf32>
    %9 = arith.maximumf %7, %8 : vector<8x128xf32>
    %c1 = arith.constant 1 : index
    %c0_8 = arith.constant 0 : index
    %c0_9 = arith.constant 0 : index
    %10 = vector.load %arg2[%c1, %c0_8, %c0_9] : memref<3x128x128xf32, #tpu.memory_space<vmem>>, vector<1x128x128xf32>
    %11 = vector.shape_cast %10 : vector<1x128x128xf32> to vector<128x128xf32>
    %cst_10 = arith.constant dense<0.000000e+00> : vector<8x128xf32>
    %12 = tpu.matmul %9, %11, %cst_10 {dimension_numbers = #tpu.dot_dimension_numbers<[1], [0], [0], [1], [0, 0, 1, 1], [], []>} : vector<8x128xf32>, vector<128x128xf32>, vector<8x128xf32> -> vector<8x128xf32>
    %c1_11 = arith.constant 1 : index
    %c0_12 = arith.constant 0 : index
    %c0_13 = arith.constant 0 : index
    %13 = vector.load %arg3[%c1_11, %c0_12, %c0_13] : memref<3x1x128xf32, #tpu.memory_space<vmem>>, vector<1x1x128xf32>
    %14 = vector.shape_cast %13 : vector<1x1x128xf32> to vector<1x128xf32>
    %15 = vector.broadcast %14 : vector<1x128xf32> to vector<8x128xf32>
    %16 = arith.addf %12, %15 : vector<8x128xf32>
    %cst_14 = arith.constant 0.000000e+00 : f32
    %17 = vector.broadcast %cst_14 : f32 to vector<8x128xf32>
    %18 = arith.maximumf %16, %17 : vector<8x128xf32>
    %c2 = arith.constant 2 : index
    %c0_15 = arith.constant 0 : index
    %c0_16 = arith.constant 0 : index
    %19 = vector.load %arg2[%c2, %c0_15, %c0_16] : memref<3x128x128xf32, #tpu.memory_space<vmem>>, vector<1x128x128xf32>
    %20 = vector.shape_cast %19 : vector<1x128x128xf32> to vector<128x128xf32>
    %cst_17 = arith.constant dense<0.000000e+00> : vector<8x128xf32>
    %21 = tpu.matmul %18, %20, %cst_17 {dimension_numbers = #tpu.dot_dimension_numbers<[1], [0], [0], [1], [0, 0, 1, 1], [], []>} : vector<8x128xf32>, vector<128x128xf32>, vector<8x128xf32> -> vector<8x128xf32>
    %c2_18 = arith.constant 2 : index
    %c0_19 = arith.constant 0 : index
    %c0_20 = arith.constant 0 : index
    %22 = vector.load %arg3[%c2_18, %c0_19, %c0_20] : memref<3x1x128xf32, #tpu.memory_space<vmem>>, vector<1x1x128xf32>
    %23 = vector.shape_cast %22 : vector<1x1x128xf32> to vector<1x128xf32>
    %24 = vector.broadcast %23 : vector<1x128xf32> to vector<8x128xf32>
    %25 = arith.addf %21, %24 : vector<8x128xf32>
    %cst_21 = arith.constant dense<0xFF800000> : vector<8xf32>
    %26 = vector.multi_reduction <maximumf>, %25, %cst_21 [1] : vector<8x128xf32> to vector<8xf32>
    %27 = vector.shape_cast %26 : vector<8xf32> to vector<8x1xf32>
    %28 = vector.broadcast %27 : vector<8x1xf32> to vector<8x128xf32>
    %29 = arith.subf %25, %28 : vector<8x128xf32>
    %30 = math.exp %29 : vector<8x128xf32>
    %cst_22 = arith.constant dense<0.000000e+00> : vector<8xf32>
    %31 = vector.multi_reduction <add>, %30, %cst_22 [1] : vector<8x128xf32> to vector<8xf32>
    %32 = vector.shape_cast %31 : vector<8xf32> to vector<8x1xf32>
    %33 = tpu.reciprocal %32 : vector<8x1xf32> -> vector<8x1xf32>
    %34 = vector.broadcast %33 : vector<8x1xf32> to vector<8x128xf32>
    %35 = arith.mulf %30, %34 : vector<8x128xf32>
    %c0_23 = arith.constant 0 : index
    %c0_24 = arith.constant 0 : index
    %36 = vector.load %arg4[%c0_23, %c0_24] : memref<8x128xf32, #tpu.memory_space<vmem>>, vector<8x128xf32>
    tpu.vector_store %arg4[%c0_23, %c0_24], %35 {strides = array<i32>} : memref<8x128xf32, #tpu.memory_space<vmem>>, vector<8x128xf32>,
    return
  }
  func.func @transform_0(%arg0: i32) -> (i32, i32) {
    %c0_i32 = arith.constant 0 : i32
    %c0_i32_0 = arith.constant 0 : i32
    return %arg0, %c0_i32 : i32, i32
  }
  func.func @transform_1(%arg0: i32) -> (i32, i32, i32) {
    %c0_i32 = arith.constant 0 : i32
    %c0_i32_0 = arith.constant 0 : i32
    %c0_i32_1 = arith.constant 0 : i32
    %c0_i32_2 = arith.constant 0 : i32
    return %c0_i32, %c0_i32_0, %c0_i32_1 : i32, i32, i32
  }
  func.func @transform_2(%arg0: i32) -> (i32, i32, i32) {
    %c0_i32 = arith.constant 0 : i32
    %c0_i32_0 = arith.constant 0 : i32
    %c0_i32_1 = arith.constant 0 : i32
    %c0_i32_2 = arith.constant 0 : i32
    return %c0_i32, %c0_i32_0, %c0_i32_1 : i32, i32, i32
  }
  func.func @transform_3(%arg0: i32) -> (i32, i32) {
    %c0_i32 = arith.constant 0 : i32
    %c0_i32_0 = arith.constant 0 : i32
    return %arg0, %c0_i32 : i32, i32
  }
}

</mosaic_0001>

<bundles_post_ra>
// kernel: tpu_custom_call.1
= control target key start
LH: loop header
LB: loop body
LE: loop exit
PB: predicated region body
PF: predicated region fallthrough
CT: control target
= control target key end

     0   :  { %8 = vsyncpa [#allocation3], 0  ;;  %s780_s0 = inlined_call_operand.hbm [shape: f32[8,128], index: 0, kind: input, shape index: {}]   ;;  %s781_s1 = inlined_call_operand.hbm [shape: f32[3,128,128], index: 1, kind: input, shape index: {}]   ;;  %s782_s2 = inlined_call_operand.vmem [shape: f32[3,1,128], index: 2, kind: input, shape index: {}]   ;;  %s783_s3 = inlined_call_operand.hbm [shape: f32[8,128], index: 3, kind: output, shape index: {}]  }
   0x1   :  { %9 = vsyncpa [#allocation6], 0 }
   0x2   :  { %10 = vsyncpa [#allocation4], 0  ;;  %s670_s12 = smov [#allocation2]   ;;  %s671_s14 = smov [#allocation5]  }
   0x3   :  { %s17_s13 = sshll.u32 %s670_s12, 4  ;;  %s26_s15 = sshll.u32 %s671_s14, 4  ;;  %s18_s13 = int_to_ptr.vmem [resolvable:$true] %s17_s13  ;;  %s698_s15 = int_to_ptr.vmem [resolvable:$true] %s26_s15 }
   0x4   :  { %s598_s18 = scalar_lea.hbm %s780_s0, 128 }
   0x5   :  { %p599_p0 = scmp.ne.s32.totalorder %s780_s0, %s598_s18  ;;  %p602_p1 = scmp.lt.u32.totalorder %s598_s18, %s780_s0 }
   0x7   :  { %p604_p2 = pnand %p602_p1, %p599_p0 }
   0x9   :  { %607 = shalt.err (!%p604_p2)
}
   0xa   :  { %s608_s23 = scalar_lea.vmem %s18_s13, 128  ;;  %p613_p4 = scmp.lt.s32.totalorder %s18_s13, %s18_s13 }
   0xb   :  { %p609_p3 = scmp.ne.s32.totalorder %s18_s13, %s608_s23  ;;  %p614_p5 = scmp.lt.s32.totalorder %s608_s23, %s608_s23 }
   0xd   :  { %p615_p6 = por %p614_p5, %p613_p4 }
   0xf   :  { %p616_p7 = pnand %p615_p6, %p609_p3 }
  0x11   :  { %619 = shalt.err (!%p616_p7)
}
  0x12   :  { %20 = dma.hbm_to_vmem [thread:$0]  %s780_s0, 128, %s18_s13, [#allocation3]  }
  0x13   :  { %s620_s28 = scalar_lea.hbm %s781_s1, 6144 }
  0x14   :  { %p621_p8 = scmp.ne.s32.totalorder %s781_s1, %s620_s28  ;;  %p624_p9 = scmp.lt.u32.totalorder %s620_s28, %s781_s1 }
  0x16   :  { %p626_p10 = pnand %p624_p9, %p621_p8 }
  0x18   :  { %629 = shalt.err (!%p626_p10)
}
  0x19   :  { %s630_s6 = scalar_lea.vmem %s698_s15, 6144  ;;  %p635_p12 = scmp.lt.s32.totalorder %s698_s15, %s698_s15 }
  0x1a   :  { %p631_p11 = scmp.ne.s32.totalorder %s698_s15, %s630_s6  ;;  %p636_p13 = scmp.lt.s32.totalorder %s630_s6, %s630_s6 }
  0x1c   :  { %p637_p0 = por %p636_p13, %p635_p12 }
  0x1e   :  { %p638_p1 = pnand %p637_p0, %p631_p11 }
  0x20   :  { %641 = shalt.err (!%p638_p1)
}
  0x21   :  { %s672_s0 = smov 128   ;;  %s673_s7 = smov 8  }
  0x22   :  { %32 = dma.hbm_to_vmem [thread:$0]  %s781_s1, 6144, %s698_s15, [#allocation6], %s672_s0, %s672_s0, %s673_s7  }
  0x23   :  { %664 = dma.done.wait [#allocation3], 128  }
  0x24   :  { %665 = vsyncadd [#allocation3], 4294967168 }
  0x25   :  { %666 = dma.done.wait [#allocation6], 6144  }
  0x26   :  { %667 = vsyncadd [#allocation6], 4294961152  ;;  %v674_v0 = vmov 0.0|0.0   ;;  %vm675_vm0 = vmmov 0   ;;  %v676_v1 = vmov 0.0   ;;  %v42_v2 = vld [vmem:[#allocation5] sm:$0xff] }
  0x27   :  { %514 = vmatprep.subr.bf16.mxu0 %v674_v0  ;;  %441 = vmatprep.mubr.msk.f32.mxu0 %vm675_vm0, %v676_v1  ;;  %v43_v3 = vld [vmem:[#allocation5 + $0x8] sm:$0xff]  ;;  %v44_v4 = vld [vmem:[#allocation5 + $0x10] sm:$0xff]  ;;  %v45_v6 = vld [vmem:[#allocation5 + $0x18] sm:$0xff]  ;;  %s677_s15 = smov [#allocation7]  }
  0x28   :  { %538 = vmatprep.subr.bf16.mxu1 %v674_v0  ;;  %476 = vmatprep.mubr.msk.f32.mxu1 %vm675_vm0, %v676_v1  ;;  %v515_v5 = vpack.c.bf16 %v43_v3, %v42_v2  ;;  %v518_v7 = vpack.c.bf16 %v45_v6, %v44_v4  ;;  %v46_v8 = vld [vmem:[#allocation5 + $0x20] sm:$0xff]  ;;  %v47_v9 = vld [vmem:[#allocation5 + $0x28] sm:$0xff]  ;;  %v139_v12 = vld [vmem:[#allocation5 + $0x90] sm:$0xff]  ;;  %s343_s16 = sshll.u32 %s677_s15, 4  ;;  %s344_s16 = int_to_ptr.vmem [resolvable:$true] %s343_s16 }
  0x29   :  { %v137_v10 = vld [vmem:[#allocation5 + $0x80] sm:$0xff]  ;;  %v138_v11 = vld [vmem:[#allocation5 + $0x88] sm:$0xff]  ;;  %v140_v13 = vld [vmem:[#allocation5 + $0x98] sm:$0xff]  ;;  %v521_v14 = vpack.c.bf16 %v47_v9, %v46_v8  ;;  %s642_s17 = scalar_lea.vmem %s344_s16, 128  ;;  %p647_p3 = scmp.lt.s32.totalorder %s344_s16, %s344_s16 }
  0x2a   :  { %516 = vmatpush3.bf16.msra.mxu0 %v515_v5  ;;  %v539_v15 = vpack.c.bf16 %v138_v11, %v137_v10  ;;  %v48_v16 = vld [vmem:[#allocation5 + $0x30] sm:$0xff]  ;;  %v49_v17 = vld [vmem:[#allocation5 + $0x38] sm:$0xff]  ;;  %v542_v18 = vpack.c.bf16 %v140_v13, %v139_v12  ;;  %v141_v19 = vld [vmem:[#allocation5 + $0xa0] sm:$0xff]  ;;  %p643_p2 = scmp.ne.s32.totalorder %s344_s16, %s642_s17  ;;  %p648_p4 = scmp.lt.s32.totalorder %s642_s17, %s642_s17 }
  0x2b   :  { %517 = vmatprep.subr.bf16.mxu0 %v674_v0  ;;  %v142_v20 = vld [vmem:[#allocation5 + $0xa8] sm:$0xff]  ;;  %v524_v21 = vpack.c.bf16 %v49_v17, %v48_v16  ;;  %v50_v22 = vld [vmem:[#allocation5 + $0x40] sm:$0xff]  ;;  %v143_v25 = vld [vmem:[#allocation5 + $0xb0] sm:$0xff] }
  0x2c   :  { %540 = vmatpush3.bf16.msra.mxu1 %v539_v15  ;;  %v51_v23 = vld [vmem:[#allocation5 + $0x48] sm:$0xff]  ;;  %v545_v24 = vpack.c.bf16 %v142_v20, %v141_v19  ;;  %v144_v26 = vld [vmem:[#allocation5 + $0xb8] sm:$0xff]  ;;  %v52_v28 = vld [vmem:[#allocation5 + $0x50] sm:$0xff]  ;;  %p649_p5 = por %p648_p4, %p647_p3 }
  0x2d   :  { %541 = vmatprep.subr.bf16.mxu1 %v674_v0  ;;  %v527_v27 = vpack.c.bf16 %v51_v23, %v50_v22  ;;  %v53_v29 = vld [vmem:[#allocation5 + $0x58] sm:$0xff]  ;;  %v548_v30 = vpack.c.bf16 %v144_v26, %v143_v25  ;;  %v145_v31 = vld [vmem:[#allocation5 + $0xc0] sm:$0xff]  ;;  %v146_v32 = vld [vmem:[#allocation5 + $0xc8] sm:$0xff] }
  0x2e   :  { %519 = vmatpush3.bf16.msra.mxu0 %v518_v7  ;;  %v530_v33 = vpack.c.bf16 %v53_v29, %v52_v28  ;;  %v54_v34 = vld [vmem:[#allocation5 + $0x60] sm:$0xff]  ;;  %v55_v35 = vld [vmem:[#allocation5 + $0x68] sm:$0xff]  ;;  %v551_v36 = vpack.c.bf16 %v146_v32, %v145_v31  ;;  %v147_v37 = vld [vmem:[#allocation5 + $0xd0] sm:$0xff]  ;;  %p650_p6 = pnand %p649_p5, %p643_p2 }
  0x2f   :  { %520 = vmatprep.subr.bf16.mxu0 %v674_v0  ;;  %v148_v38 = vld [vmem:[#allocation5 + $0xd8] sm:$0xff]  ;;  %v533_v39 = vpack.c.bf16 %v55_v35, %v54_v34  ;;  %v56_v40 = vld [vmem:[#allocation5 + $0x70] sm:$0xff]  ;;  %v149_v43 = vld [vmem:[#allocation5 + $0xe0] sm:$0xff] }
  0x30   :  { %543 = vmatpush3.bf16.msra.mxu1 %v542_v18  ;;  %v57_v41 = vld [vmem:[#allocation5 + $0x78] sm:$0xff]  ;;  %v554_v42 = vpack.c.bf16 %v148_v38, %v147_v37  ;;  %v150_v44 = vld [vmem:[#allocation5 + $0xe8] sm:$0xff]  ;;  %v151_v48 = vld [vmem:[#allocation5 + $0xf0] sm:$0xff] }
  0x31   :  { %544 = vmatprep.subr.bf16.mxu1 %v674_v0  ;;  %v536_v45 = vpack.c.bf16 %v57_v41, %v56_v40  ;;  %v557_v46 = vpack.c.bf16 %v150_v44, %v149_v43  ;;  %v41_v47 = vld [vmem:[#allocation2] sm:$0xff]  ;;  %v233_v51 = vld [vmem:[#allocation5 + $0x100] sm:$0xff]  ;;  %v234_v52 = vld [vmem:[#allocation5 + $0x108] sm:$0xff] }
  0x32   :  { %522 = vmatpush3.bf16.msra.mxu0 %v521_v14  ;;  %v152_v49 = vld [vmem:[#allocation5 + $0xf8] sm:$0xff]  ;;  %v235_v53 = vld [vmem:[#allocation5 + $0x110] sm:$0xff]  ;;  %v563_v54 = vpack.c.bf16 %v234_v52, %v233_v51  ;;  %v237_v57 = vld [vmem:[#allocation5 + $0x120] sm:$0xff] }
  0x33   :  { %523 = vmatprep.subr.bf16.mxu0 %v674_v0  ;;  %v560_v50 = vpack.c.bf16 %v152_v49, %v151_v48  ;;  %v236_v55 = vld [vmem:[#allocation5 + $0x118] sm:$0xff]  ;;  %v238_v58 = vld [vmem:[#allocation5 + $0x128] sm:$0xff]  ;;  %v239_v60 = vld [vmem:[#allocation5 + $0x130] sm:$0xff] }
  0x34   :  { %546 = vmatpush3.bf16.msra.mxu1 %v545_v24  ;;  %v566_v56 = vpack.c.bf16 %v236_v55, %v235_v53  ;;  %v569_v59 = vpack.c.bf16 %v238_v58, %v237_v57  ;;  %v240_v61 = vld [vmem:[#allocation5 + $0x138] sm:$0xff]  ;;  %v241_v63 = vld [vmem:[#allocation5 + $0x140] sm:$0xff]  ;;  %v243_v3 = vld [vmem:[#allocation5 + $0x150] sm:$0xff] }
  0x35   :  { %547 = vmatprep.subr.bf16.mxu1 %v674_v0  ;;  %v572_v62 = vpack.c.bf16 %v240_v61, %v239_v60  ;;  %v244_v4 = vld [vmem:[#allocation5 + $0x158] sm:$0xff]  ;;  %v245_v6 = vld [vmem:[#allocation5 + $0x160] sm:$0xff]  ;;  %v246_v7 = vld [vmem:[#allocation5 + $0x168] sm:$0xff] }
  0x36   :  { %525 = vmatpush3.bf16.msra.mxu0 %v524_v21  ;;  %v578_v5 = vpack.c.bf16 %v244_v4, %v243_v3  ;;  %v581_v8 = vpack.c.bf16 %v246_v7, %v245_v6  ;;  %v353_v9 = vld [vmem:[%s782_s2] ss:$0 sm:$0xff]  ;;  %v247_v14 = vld [vmem:[#allocation5 + $0x170] sm:$0xff]  ;;  %v355_v17 = vld [vmem:[%s782_s2 + $0x1] ss:$0 sm:$0xff] }
  0x37   :  { %526 = vmatprep.subr.bf16.mxu0 %v674_v0  ;;  %v248_v15 = vld [vmem:[#allocation5 + $0x178] sm:$0xff] }
  0x38   :  { %549 = vmatpush3.bf16.msra.mxu1 %v548_v30  ;;  %v584_v16 = vpack.c.bf16 %v248_v15, %v247_v14  ;;  %v357_v21 = vld [vmem:[%s782_s2 + $0x2] ss:$0 sm:$0xff] }
  0x39   :  { %550 = vmatprep.subr.bf16.mxu1 %v674_v0 }
  0x3a   :  { %528 = vmatpush3.bf16.msra.mxu0 %v527_v27 }
  0x3b   :  { %529 = vmatprep.subr.bf16.mxu0 %v674_v0 }
  0x3c   :  { %552 = vmatpush3.bf16.msra.mxu1 %v551_v36 }
  0x3d   :  { %553 = vmatprep.subr.bf16.mxu1 %v674_v0 }
  0x3e   :  { %531 = vmatpush3.bf16.msra.mxu0 %v530_v33 }
  0x3f   :  { %532 = vmatprep.subr.bf16.mxu0 %v674_v0 }
  0x40   :  { %555 = vmatpush3.bf16.msra.mxu1 %v554_v42 }
  0x41   :  { %556 = vmatprep.subr.bf16.mxu1 %v674_v0 }
  0x42   :  { %534 = vmatpush3.bf16.msra.mxu0 %v533_v39 }
  0x43   :  { %535 = vmatprep.subr.bf16.mxu0 %v674_v0 }
  0x44   :  { %558 = vmatpush3.bf16.msra.mxu1 %v557_v46 }
  0x45   :  { %559 = vmatprep.subr.bf16.mxu1 %v674_v0 }
  0x46   :  { %537 = vmatpush3.bf16.msra.mxu0 %v536_v45 }
  0x47   :  { %562 = vmatprep.subr.bf16.mxu0 %v674_v0 }
  0x48   :  { %561 = vmatpush3.bf16.msra.mxu1 %v560_v50 }
  0x49   :  { %442 = vmatmul.mubr.f32.vlgmr.msra.gmra.mrb[0].mxu0 %v41_v47 }
  0x4a   :  { %511 = vmatprep.mubr.msk.f32.mxu0 %vm675_vm0, %v676_v1  ;;  %564 = vmatpush3.bf16.msra.mxu0 %v563_v54  ;;  %v242_v1 = vld [vmem:[#allocation5 + $0x148] sm:$0xff] }
  0x4b   :  { %565 = vmatprep.subr.bf16.mxu0 %v674_v0  ;;  %v575_v2 = vpack.c.bf16 %v242_v1, %v241_v63 }
  0x4e   :  { %567 = vmatpush3.bf16.msra.mxu0 %v566_v56 }
  0x4f   :  { %568 = vmatprep.subr.bf16.mxu0 %v674_v0 }
  0x52   :  { %570 = vmatpush3.bf16.msra.mxu0 %v569_v59 }
  0x53   :  { %571 = vmatprep.subr.bf16.mxu0 %v674_v0 }
  0x56   :  { %573 = vmatpush3.bf16.msra.mxu0 %v572_v62 }
  0x57   :  { %574 = vmatprep.subr.bf16.mxu0 %v674_v0 }
  0x5a   :  { %576 = vmatpush3.bf16.msra.mxu0 %v575_v2 }
  0x5b   :  { %577 = vmatprep.subr.bf16.mxu0 %v674_v0 }
  0x5e   :  { %579 = vmatpush3.bf16.msra.mxu0 %v578_v5 }
  0x5f   :  { %580 = vmatprep.subr.bf16.mxu0 %v674_v0 }
  0x62   :  { %582 = vmatpush3.bf16.msra.mxu0 %v581_v8 }
  0x63   :  { %583 = vmatprep.subr.bf16.mxu0 %v674_v0 }
  0x66   :  { %585 = vmatpush3.bf16.msra.mxu0 %v584_v16 }
 0x11c   :  { %v131_v10 = vpop.f32.mrb[0].mxu0 }
 0x11d   :  { %v132_v11 = vadd.f32 %v353_v9, %v131_v10  ;;  %v443_v12 = vpop.f32.mrb[1].mxu0 }
 0x11f   :  { %v135_v13 = vmax.f32 %v132_v11, 0.0 }
 0x121   :  { %477 = vmatmul.mubr.f32.vlgmr.msra.gmra.mrb[0].mxu1 %v135_v13 }
 0x1f4   :  { %v227_v18 = vpop.f32.mrb[0].mxu1 }
 0x1f5   :  { %v228_v19 = vadd.f32 %v355_v17, %v227_v18  ;;  %v478_v0 = vpop.f32.mrb[1].mxu1 }
 0x1f7   :  { %v231_v20 = vmax.f32 %v228_v19, 0.0 }
 0x1f9   :  { %512 = vmatmul.mubr.f32.vlgmr.msra.gmra.mrb[2].mxu0 %v231_v20 }
 0x2cc   :  { %v323_v22 = vpop.f32.mrb[2].mxu0 }
 0x2cd   :  { %v324_v23 = vadd.f32 %v357_v21, %v323_v22  ;;  %v513_v24 = vpop.f32.mrb[3].mxu0 }
 0x2cf   :  { %327 = vmax.xlane.f32.xlu0 %v324_v23 }
 0x35c   :  { %v328_v25 = vpop.xlane.xlu0 %327 }
 0x35d   :  { %v329_v26 = vsub.f32 %v324_v23, %v328_v25 }
 0x35f   :  { %v330_v27 = vmul.f32 1.442695, %v329_v26 }
 0x361   :  { %594 = vpow2.f32 %v330_v27 }
 0x36b   :  { %v595_v28 = vpop.eup %594 }
 0x36c   :  { %332 = vadd.xlane.f32.xlu0 %v595_v28 }
 0x3f9   :  { %v333_v29 = vpop.xlane.xlu0 %332 }
 0x3fa   :  { %596 = vrcp.f32 %v333_v29 }
 0x404   :  { %v597_v30 = vpop.eup %596 }
 0x405   :  { %v335_v31 = vmul.f32 %v597_v30, %v595_v28 }
 0x407   :  { %336 = vst [vmem:[#allocation7] sm:$0xff] %v335_v31 }
 0x408   :  { %653 = shalt.err (!%p650_p6)
}
 0x409   :  { %s654_s19 = scalar_lea.hbm %s783_s3, 128 }
 0x40a   :  { %p655_p7 = scmp.ne.s32.totalorder %s783_s3, %s654_s19  ;;  %p658_p8 = scmp.lt.u32.totalorder %s654_s19, %s783_s3 }
 0x40c   :  { %p660_p9 = pnand %p658_p8, %p655_p7 }
 0x40e   :  { %663 = shalt.err (!%p660_p9)
}
 0x40f   :  { %346 = dma.vmem_to_hbm [thread:$0]  %s344_s16, 128, %s783_s3, [#allocation4]  }
 0x410   :  { %668 = dma.done.wait [#allocation4], 128  }
 0x411   :  { %669 = vsyncadd [#allocation4], 4294967168 }
 0x412   :  { %350 = vsyncpa [#allocation3], 1 }
 0x413   :  { %351 = vsyncpa [#allocation6], 1 }
 0x414   :  { %352 = vsyncpa [#allocation4], 1 }

</bundles_post_ra>
